<compile_context>
chip_gen: v7x
topology: tpu7x:2x2x1
jax: 0.10.0
libtpu: 0.0.40
codegen_flags: <defaults>
</compile_context>

<pallas_src>
import functools

import jax
import jax.numpy as jnp
from jax.experimental import pallas as pl
from jax.experimental.pallas import tpu as pltpu

_MIB = 1024 * 1024


def _h_sigmoid(x):
    # The original module: ReLU6(x + 3) / 6.
    return jnp.clip(x + 3.0, 0.0, 6.0) * (1.0 / 6.0)


def _vmem_budget_bytes():
    """Per-generation VMEM budget with headroom below physical capacity."""
    cap = 64 * _MIB  # conservative (v7x-sized) fallback
    try:
        info = pltpu.get_tpu_info()
        cap = int(getattr(info, "vmem_capacity_bytes", cap))
    except Exception:
        pass
    # ~48 MiB on v7x (64 MiB phys), ~96 MiB on v5e/v6e (128 MiB phys).
    return max(min(int(cap * 0.75), 96 * _MIB), 16 * _MIB)


# ----------------------------------------------------------------------------
# Standalone h_sigmoid kernel (the spec module itself, elementwise, HBM-bound).
# ----------------------------------------------------------------------------
def _h_sigmoid_kernel(x_ref, o_ref):
    o_ref[...] = _h_sigmoid(x_ref[...])


def h_sigmoid_pallas(x):
    """Elementwise h_sigmoid over an arbitrary-shaped array."""
    if x.size == 0:
        return x
    dtype = x.dtype
    itemsize = jnp.dtype(dtype).itemsize
    T = int(x.size)

    # Lane-dense re-view: large multiple-of-128 lane width; pad tail if needed.
    LANE = 128
    pad = 0
    for lane in (4096, 2048, 1024, 512, 256, 128):
        if T % lane == 0:
            LANE = lane
            break
    else:
        pad = (-T) % LANE

    flat = x.reshape(-1)
    if pad:
        flat = jnp.pad(flat, (0, pad))
    Tp = T + pad
    M = Tp // LANE

    budget = _vmem_budget_bytes()
    row_bytes = LANE * itemsize
    # ~2 MiB per block; 2 in-bufs + 2 out-bufs must fit the VMEM budget.
    tm_target = max(1, (2 * _MIB) // row_bytes)
    tm_cap = max(1, (budget - 2 * _MIB) // (4 * row_bytes))
    tm = min(M, tm_target, tm_cap)
    # Guarantee >=2 parallel grid steps (v7x megacore) when there are enough
    # rows to keep the sublane-aligned (multiple-of-8) block rule.
    if M >= 16:
        tm = min(tm, pl.cdiv(M, 2))
    if tm < M:
        tm = max(8, (tm // 8) * 8)
        tm = min(tm, M)

    out = pl.pallas_call(
        _h_sigmoid_kernel,
        out_shape=jax.ShapeDtypeStruct((M, LANE), dtype),
        grid=(pl.cdiv(M, tm),),
        in_specs=[pl.BlockSpec((tm, LANE), lambda i: (i, 0))],
        out_specs=pl.BlockSpec((tm, LANE), lambda i: (i, 0)),
        compiler_params=pltpu.CompilerParams(
            dimension_semantics=("parallel",), vmem_limit_bytes=budget),
        cost_estimate=pl.CostEstimate(
            flops=3 * Tp, transcendentals=0,
            bytes_accessed=2 * Tp * itemsize),
    )(flat.reshape(M, LANE))

    out = out.reshape(-1)
    if pad:
        out = out[:T]
    return out.reshape(x.shape)


# ----------------------------------------------------------------------------
# Single-pass SE kernel: read x once, write once (HBM-optimal).
# ----------------------------------------------------------------------------
def _se_single_pass_kernel(x_ref, w1_ref, b1_ref, w2_ref, b2_ref, o_ref):
    # x_ref: (bb, C, N); w1: (C, H) and w2: (H, C) are contraction-ready.
    y = jnp.mean(x_ref[...].astype(jnp.float32), axis=-1)                 # (bb, C)
    h = jnp.dot(y, w1_ref[...], preferred_element_type=jnp.float32) + b1_ref[...]
    h = jnp.maximum(h, 0.0)                                               # (bb, H)
    s = jnp.dot(h, w2_ref[...], preferred_element_type=jnp.float32) + b2_ref[...]
    s = _h_sigmoid(s)                                                     # (bb, C)
    # Re-read the ref for the scale pass (no big live value across both uses).
    o_ref[...] = (x_ref[...].astype(jnp.float32) * s[:, :, None]).astype(o_ref.dtype)


def _pick_batch_block(B, C, N, itemsize, budget, param_bytes):
    """Batch rows per grid step: ~4 MiB slabs, 4 buffers in flight, >=2 steps."""
    row_bytes = C * N * itemsize
    overhead = 2 * param_bytes + 2 * _MIB
    avail = budget - overhead
    if avail < 4 * row_bytes:
        return None                       # not even bb=1 fits -> two-pass
    bb_cap = avail // (4 * row_bytes)     # 2 in-bufs + 2 out-bufs
    bb_target = max(1, (4 * _MIB) // row_bytes)
    bb = min(B, bb_cap, bb_target)
    if B >= 2:                            # keep both v7x TensorCores busy
        bb = min(bb, pl.cdiv(B, 2))
    return max(1, bb)


def _se_single_pass(x, w1_t, b1_2d, w2_t, b2_2d, *, bb, budget, donate_x=False):
    B, C, N = x.shape
    H = w1_t.shape[1]
    itemsize = jnp.dtype(x.dtype).itemsize
    param_count = 2 * C * H + H + C
    return pl.pallas_call(
        _se_single_pass_kernel,
        out_shape=jax.ShapeDtypeStruct((B, C, N), x.dtype),
        grid=(pl.cdiv(B, bb),),
        in_specs=[
            pl.BlockSpec((bb, C, N), lambda b: (b, 0, 0)),
            # Grid-invariant params: constant index maps -> stay resident.
            pl.BlockSpec((C, H), lambda b: (0, 0)),
            pl.BlockSpec((1, H), lambda b: (0, 0)),
            pl.BlockSpec((H, C), lambda b: (0, 0)),
            pl.BlockSpec((1, C), lambda b: (0, 0)),
        ],
        out_specs=pl.BlockSpec((bb, C, N), lambda b: (b, 0, 0)),
        input_output_aliases={0: 0} if donate_x else {},
        compiler_params=pltpu.CompilerParams(
            dimension_semantics=("parallel",), vmem_limit_bytes=budget),
        cost_estimate=pl.CostEstimate(
            flops=2 * B * C * N + 4 * B * C * H,
            transcendentals=0,
            bytes_accessed=2 * B * C * N * itemsize + (B * C + param_count) * 4),
    )(x, w1_t, b1_2d, w2_t, b2_2d)


# ----------------------------------------------------------------------------
# Two-pass fallback (when the full (bb,C,N) slab does not fit VMEM, or B==1
# and N is large enough to split across cores):
#   pass 1: tiled mean over N  -> (B, 1, C) lane-dense
#   excite MLP in plain JAX (tiny)
#   pass 2: broadcast-multiply, lane-dense N tiles, fully parallel grid.
# ----------------------------------------------------------------------------
def _mean_kernel(x_ref, y_ref, *, n_valid, inv_n):
    nt = pl.program_id(1)

    @pl.when(nt == 0)
    def _():
        y_ref[...] = jnp.zeros_like(y_ref)

    xf = x_ref[...].astype(jnp.float32)                       # (1, C, tn)
    tn = xf.shape[-1]
    # Mask the tail columns of a partial (cdiv) last block.
    col = nt * tn + jax.lax.broadcasted_iota(jnp.int32, xf.shape, 2)
    xf = jnp.where(col < n_valid, xf, 0.0)
    y_ref[...] += jnp.sum(xf, axis=-1)[:, None, :]            # -> (1, 1, C)

    @pl.when(nt == pl.num_programs(1) - 1)
    def _():
        y_ref[...] *= inv_n


def _scale_kernel(x_ref, s_ref, o_ref):
    # x_ref/o_ref: (1, C, tn); s_ref: (1, C, 1) broadcasts over the lane dim.
    o_ref[...] = (x_ref[...].astype(jnp.float32) * s_ref[...]).astype(o_ref.dtype)


def _excite(y, w1_t, b1_2d, w2_t, b2_2d):
    h = jnp.maximum(y @ w1_t + b1_2d, 0.0)
    return _h_sigmoid(h @ w2_t + b2_2d)


def _pick_n_tile(N, C, itemsize, budget, *, min_steps=1):
    """Lane-aligned (multiple-of-128) N tile, ~2 MiB per block, VMEM-capped."""
    if N <= 128:
        return N
    bytes_per_col = max(1, C * itemsize)
    target = max(128, ((2 * _MIB) // bytes_per_col) // 128 * 128)
    cap = max(128, ((budget - 4 * _MIB) // (4 * bytes_per_col)) // 128 * 128)
    tn = min(target, cap)
    if min_steps > 1:
        tn = min(tn, max(128, pl.cdiv(pl.cdiv(N, min_steps), 128) * 128))
    return N if tn >= N else tn


def _se_two_pass(x, w1_t, b1_2d, w2_t, b2_2d, *, budget, n_tile=None, donate_x=False):
    B, C, N = x.shape
    itemsize = jnp.dtype(x.dtype).itemsize

    # Pass 1: tiled mean (reduction axis last, lane-dense (1,1,C) accumulator).
    tn = n_tile if n_tile is not None else _pick_n_tile(N, C, itemsize, budget)
    tn = min(tn, N)
    nt = pl.cdiv(N, tn)
    y = pl.pallas_call(
        functools.partial(_mean_kernel, n_valid=N, inv_n=1.0 / N),
        out_shape=jax.ShapeDtypeStruct((B, 1, C), jnp.float32),
        grid=(B, nt),
        in_specs=[pl.BlockSpec((1, C, tn), lambda b, n: (b, 0, n))],
        out_specs=pl.BlockSpec((1, 1, C), lambda b, n: (b, 0, 0)),
        compiler_params=pltpu.CompilerParams(
            dimension_semantics=("parallel", "arbitrary"),
            vmem_limit_bytes=budget),
        cost_estimate=pl.CostEstimate(
            flops=2 * B * C * N, transcendentals=0,
            bytes_accessed=B * C * N * itemsize + B * C * 4),
    )(x)

    # Tiny excite MLP in plain JAX (noise next to the HBM traffic of x).
    s = _excite(y[:, 0, :], w1_t, b1_2d, w2_t, b2_2d)          # (B, C) f32
    s3 = s[:, :, None]                                         # (B, C, 1)

    # Pass 2: broadcast-multiply; both grid axes parallel. If B == 1, split N
    # into >=2 tiles so both v7x TensorCores get work.
    tn2 = n_tile if n_tile is not None else _pick_n_tile(
        N, C, itemsize, budget, min_steps=(2 if B < 2 else 1))
    tn2 = min(tn2, N)
    nt2 = pl.cdiv(N, tn2)
    return pl.pallas_call(
        _scale_kernel,
        out_shape=jax.ShapeDtypeStruct((B, C, N), x.dtype),
        grid=(B, nt2),
        in_specs=[pl.BlockSpec((1, C, tn2), lambda b, n: (b, 0, n)),
                  pl.BlockSpec((1, C, 1), lambda b, n: (b, 0, 0))],
        out_specs=pl.BlockSpec((1, C, tn2), lambda b, n: (b, 0, n)),
        input_output_aliases={0: 0} if donate_x else {},
        compiler_params=pltpu.CompilerParams(
            dimension_semantics=("parallel", "parallel"),
            vmem_limit_bytes=budget),
        cost_estimate=pl.CostEstimate(
            flops=B * C * N, transcendentals=0,
            bytes_accessed=2 * B * C * N * itemsize + B * C * 4),
    )(x, s3)


# ----------------------------------------------------------------------------
# Public wrapper (PyTorch Linear layouts: w1 (H, C), b1 (H,), w2 (C, H), b2 (C,)).
# ----------------------------------------------------------------------------
def se_layer(x, w1, b1, w2, b2, *, force_two_pass=False, n_tile=None, donate_x=False):
    B, C, N = x.shape
    H = w1.shape[0]
    # Pre-transpose once in XLA so in-kernel matmuls are contraction-ready.
    w1_t = jnp.transpose(w1).astype(jnp.float32)     # (C, H)
    w2_t = jnp.transpose(w2).astype(jnp.float32)     # (H, C)
    b1_2d = b1.reshape(1, H).astype(jnp.float32)
    b2_2d = b2.reshape(1, C).astype(jnp.float32)

    itemsize = jnp.dtype(x.dtype).itemsize
    budget = _vmem_budget_bytes()
    param_bytes = 4 * (2 * C * H + H + C)

    # Route B==1 with enough N to the two-pass path (fully parallel (B, nt) grid).
    use_two_pass = force_two_pass or (B < 2 and N >= 256)
    bb = None if use_two_pass else _pick_batch_block(B, C, N, itemsize, budget, param_bytes)
    if bb is not None:
        return _se_single_pass(x, w1_t, b1_2d, w2_t, b2_2d,
                               bb=bb, budget=budget, donate_x=donate_x)
    return _se_two_pass(x, w1_t, b1_2d, w2_t, b2_2d,
                        budget=budget, n_tile=n_tile, donate_x=donate_x)


def se_layer_ref(x, w1, b1, w2, b2):
    # Pure-JAX reference for correctness check.
    y = jnp.mean(x, axis=-1)
    h = jnp.maximum(y @ w1.T + b1, 0.0)
    s = _h_sigmoid(h @ w2.T + b2)
    return x * s[:, :, None]


if __name__ == "__main__":
    key = jax.random.PRNGKey(0)
    kx, kxw, kxa, kxb, k1, kb1, k2, kb2 = jax.random.split(key, 8)

    # 1) The spec module itself: elementwise h_sigmoid (lane-dense re-view).
    x_a = jax.random.normal(kxa, (2, 8, 16), dtype=jnp.float32)
    hs = h_sigmoid_pallas(x_a)
    jax.block_until_ready(hs)
    assert jnp.allclose(hs, _h_sigmoid(x_a), atol=1e-6, rtol=1e-6), "h_sigmoid mismatch"

    # 1b) size not a multiple of 128 -> padded-tail path.
    x_b = jax.random.normal(kxb, (3, 5, 7), dtype=jnp.float32)
    hsb = h_sigmoid_pallas(x_b)
    jax.block_until_ready(hsb)
    assert hsb.shape == x_b.shape
    assert jnp.allclose(hsb, _h_sigmoid(x_b), atol=1e-6, rtol=1e-6), "h_sigmoid pad mismatch"

    # 2) SE layer gated by h_sigmoid — single-pass (HBM-optimal) path.
    B, C, N = 2, 8, 16
    H = C // 4
    x = jax.random.normal(kx, (B, C, N), dtype=jnp.float32)
    w1 = jax.random.normal(k1, (H, C), dtype=jnp.float32) * 0.5
    b1 = jax.random.normal(kb1, (H,), dtype=jnp.float32) * 0.1
    w2 = jax.random.normal(k2, (C, H), dtype=jnp.float32) * 0.5
    b2 = jax.random.normal(kb2, (C,), dtype=jnp.float32) * 0.1

    out = se_layer(x, w1, b1, w2, b2)
    jax.block_until_ready(out)
    ref = se_layer_ref(x, w1, b1, w2, b2)
    assert out.shape == (B, C, N)
    assert jnp.allclose(out, ref, atol=1e-5, rtol=1e-5), "single-pass mismatch"

    # 3) Two-pass fallback with a lane-aligned non-divisor N tile (masked tail).
    N2 = 200
    xw = jax.random.normal(kxw, (B, C, N2), dtype=jnp.float32)
    out2 = se_layer(xw, w1, b1, w2, b2, force_two_pass=True, n_tile=128)
    jax.block_until_ready(out2)
    ref2 = se_layer_ref(xw, w1, b1, w2, b2)
    assert jnp.allclose(out2, ref2, atol=1e-5, rtol=1e-5), "two-pass mismatch"

    print("KERNEL_OK")
</pallas_src>

<mosaic_0001>
module attributes {stable_mosaic.version = 11 : i64} {
  func.func @_h_sigmoid_kernel(%arg0: i32, %arg1: memref<1x256xf32, #tpu.memory_space<vmem>>, %arg2: memref<1x256xf32, #tpu.memory_space<vmem>>) attributes {dimension_semantics = [#tpu.dimension_semantics<parallel>], iteration_bounds = array<i64: 1>, scalar_prefetch = 0 : i64, scratch_operands = 0 : i64, tpu.core_type = #tpu.core_type<tc>, window_params = [{transform_indices = @transform_0, window_bounds = array<i64: 1, 256>}, {transform_indices = @transform_1, window_bounds = array<i64: 1, 256>}]} {
    %c0 = arith.constant 0 : index
    %c0_0 = arith.constant 0 : index
    %0 = vector.load %arg1[%c0, %c0_0] : memref<1x256xf32, #tpu.memory_space<vmem>>, vector<1x256xf32>
    %cst = arith.constant 3.000000e+00 : f32
    %1 = vector.broadcast %cst : f32 to vector<1x256xf32>
    %2 = arith.addf %0, %1 : vector<1x256xf32>
    %cst_1 = arith.constant 0.000000e+00 : f32
    %cst_2 = arith.constant 6.000000e+00 : f32
    %3 = vector.broadcast %cst_1 : f32 to vector<1x256xf32>
    %4 = arith.maximumf %3, %2 : vector<1x256xf32>
    %5 = vector.broadcast %cst_2 : f32 to vector<1x256xf32>
    %6 = arith.minimumf %5, %4 : vector<1x256xf32>
    %cst_3 = arith.constant 0.166666672 : f32
    %7 = vector.broadcast %cst_3 : f32 to vector<1x256xf32>
    %8 = arith.mulf %6, %7 : vector<1x256xf32>
    %c0_4 = arith.constant 0 : index
    %c0_5 = arith.constant 0 : index
    %9 = vector.load %arg2[%c0_4, %c0_5] : memref<1x256xf32, #tpu.memory_space<vmem>>, vector<1x256xf32>
    tpu.vector_store %arg2[%c0_4, %c0_5], %8 {strides = array<i32>} : memref<1x256xf32, #tpu.memory_space<vmem>>, vector<1x256xf32>,
    return
  }
  func.func @transform_0(%arg0: i32) -> (i32, i32) {
    %c0_i32 = arith.constant 0 : i32
    %c0_i32_0 = arith.constant 0 : i32
    return %arg0, %c0_i32 : i32, i32
  }
  func.func @transform_1(%arg0: i32) -> (i32, i32) {
    %c0_i32 = arith.constant 0 : i32
    %c0_i32_0 = arith.constant 0 : i32
    return %arg0, %c0_i32 : i32, i32
  }
}

</mosaic_0001>

<bundles_post_ra>
// kernel: tpu_custom_call.1
= control target key start
LH: loop header
LB: loop body
LE: loop exit
PB: predicated region body
PF: predicated region fallthrough
CT: control target
= control target key end

     0   :  { %6 = vsyncpa [#allocation3], 0  ;;  %s132_s0 = inlined_call_operand.hbm [shape: f32[1,256], index: 0, kind: input, shape index: {}]   ;;  %s133_s1 = inlined_call_operand.hbm [shape: f32[1,256], index: 1, kind: output, shape index: {}]  }
   0x1   :  { %7 = vsyncpa [#allocation4], 0  ;;  %s96_s6 = smov [#allocation2]   ;;  %s48_s10 = scalar_lea.hbm %s132_s0, 32 }
   0x2   :  { %s14_s7 = sshll.u32 %s96_s6, 4  ;;  %p49_p0 = scmp.ne.s32.totalorder %s132_s0, %s48_s10  ;;  %s15_s7 = int_to_ptr.vmem [resolvable:$true] %s14_s7 }
   0x3   :  { %p52_p1 = scmp.lt.u32.totalorder %s48_s10, %s132_s0 }
   0x5   :  { %p54_p2 = pnand %p52_p1, %p49_p0 }
   0x7   :  { %57 = shalt.err (!%p54_p2)
}
   0x8   :  { %s58_s15 = scalar_lea.vmem %s15_s7, 32  ;;  %p63_p4 = scmp.lt.s32.totalorder %s15_s7, %s15_s7 }
   0x9   :  { %p59_p3 = scmp.ne.s32.totalorder %s15_s7, %s58_s15  ;;  %p64_p5 = scmp.lt.s32.totalorder %s58_s15, %s58_s15 }
   0xb   :  { %p65_p6 = por %p64_p5, %p63_p4 }
   0xd   :  { %p66_p7 = pnand %p65_p6, %p59_p3 }
   0xf   :  { %69 = shalt.err (!%p66_p7)
}
  0x10   :  { %17 = dma.hbm_to_vmem [thread:$0]  %s132_s0, 32, %s15_s7, [#allocation3]  }
  0x11   :  { %92 = dma.done.wait [#allocation3], 32  }
  0x12   :  { %93 = vsyncadd [#allocation3], 4294967264  ;;  %v21_v0 = vld [vmem:[#allocation2] sm:$0x3]  ;;  %v26_v2 = vlaneseq  ;;  %s97_s18 = smov [#allocation5]  }
  0x13   :  { %v22_v1 = vadd.f32 3.0, %v21_v0  ;;  %s37_s19 = sshll.u32 %s97_s18, 4  ;;  %s38_s19 = int_to_ptr.vmem [resolvable:$true] %s37_s19 }
  0x14   :  { %vm28_vm0 = vcmp.lt.s32.totalorder %v26_v2, 256  ;;  %s70_s20 = scalar_lea.vmem %s38_s19, 32  ;;  %p75_p9 = scmp.lt.s32.totalorder %s38_s19, %s38_s19 }
  0x15   :  { %v23_v3 = vmax.f32 %v22_v1, 0.0  ;;  %p71_p8 = scmp.ne.s32.totalorder %s38_s19, %s70_s20  ;;  %p76_p10 = scmp.lt.s32.totalorder %s70_s20, %s70_s20 }
  0x17   :  { %v24_v4 = vmin.f32 %v23_v3, 6.0  ;;  %p77_p11 = por %p76_p10, %p75_p9 }
  0x19   :  { %v25_v5 = vmul.f32 0.16666667, %v24_v4  ;;  %p78_p12 = pnand %p77_p11, %p71_p8 }
  0x1b   :  { %30 = vst.msk [vmem:[#allocation5] sm:$0x3] %vm28_vm0, %v25_v5 }
  0x1c   :  { %81 = shalt.err (!%p78_p12)
}
  0x1d   :  { %s82_s22 = scalar_lea.hbm %s133_s1, 32 }
  0x1e   :  { %p83_p13 = scmp.ne.s32.totalorder %s133_s1, %s82_s22  ;;  %p86_p0 = scmp.lt.u32.totalorder %s82_s22, %s133_s1 }
  0x20   :  { %p88_p1 = pnand %p86_p0, %p83_p13 }
  0x22   :  { %91 = shalt.err (!%p88_p1)
}
  0x23   :  { %40 = dma.vmem_to_hbm [thread:$0]  %s38_s19, 32, %s133_s1, [#allocation4]  }
  0x24   :  { %94 = dma.done.wait [#allocation4], 32  }
  0x25   :  { %95 = vsyncadd [#allocation4], 4294967264 }
  0x26   :  { %44 = vsyncpa [#allocation3], 1 }
  0x27   :  { %45 = vsyncpa [#allocation4], 1 }

</bundles_post_ra>
